<compile_context>
chip_gen: v5e
topology: v5e:2x2
jax: 0.10.0
libtpu: 0.0.40
codegen_flags: <defaults>
</compile_context>

<pallas_src>
import functools
import math

import jax
import jax.numpy as jnp
from jax.experimental import pallas as pl
from jax.experimental.pallas import tpu as pltpu

_VMEM_LIMIT_BYTES = 48 * 1024 * 1024    # scoped-VMEM ceiling (safe on v5e/v6e/v7x)
_VMEM_BUDGET_BYTES = 36 * 1024 * 1024   # live-bytes budget used for tile sizing
_MAX_PACKED_WIDTH = 384                 # cap on lcm(C, 128) for the packed path
_MIN_GRID_STEPS = 4                     # keep >= this many grid steps (v7x megacore)


def _round_up(x, m):
    return ((x + m - 1) // m) * m


# ----------------------------- channels_last -----------------------------
def _ln_last_kernel(x_ref, w_ref, b_ref, o_ref, *, eps):
    """Plain path: block (TILE_M, C); reduce over the lane axis C."""
    x = x_ref[...].astype(jnp.float32)                         # (TILE_M, C)
    mean = jnp.mean(x, axis=-1, keepdims=True)
    xc = x - mean
    var = jnp.mean(xc * xc, axis=-1, keepdims=True)            # biased variance
    scale = w_ref[...].astype(jnp.float32) * jax.lax.rsqrt(var + eps)
    o_ref[...] = (xc * scale + b_ref[...].astype(jnp.float32)).astype(o_ref.dtype)


def _ln_last_packed_kernel(x_ref, w_ref, b_ref, a_ref, o_ref, *, eps, inv_c):
    """Lane-packed path: g = width / C original rows per 128-lane vector row.

    Per-segment sums are computed with one MXU matmul per statistic against a
    constant block-diagonal 0/1 matrix A (A[i, j] = 1 iff i, j are in the same
    C-wide segment), then scaled by 1/C on the VPU.  precision=HIGHEST keeps f32
    accuracy.  All elementwise work is lane-dense; every output row depends only
    on its own input row, so padded edge rows stay row-local (writes dropped).
    """
    x = x_ref[...].astype(jnp.float32)                          # (TILE_R, W)
    a = a_ref[...]                                              # (W, W) f32 in {0,1}
    mean = jnp.dot(x, a, precision=jax.lax.Precision.HIGHEST) * inv_c
    xc = x - mean
    var = jnp.dot(xc * xc, a, precision=jax.lax.Precision.HIGHEST) * inv_c
    scale = w_ref[...].astype(jnp.float32) * jax.lax.rsqrt(var + eps)
    o_ref[...] = (xc * scale + b_ref[...].astype(jnp.float32)).astype(o_ref.dtype)


def layer_norm_channels_last(x, weight, bias, eps=1e-6):
    orig_shape = x.shape
    C = orig_shape[-1]
    M = math.prod(orig_shape[:-1]) if len(orig_shape) > 1 else 1
    itemsize = jnp.dtype(x.dtype).itemsize

    # Lane packing: g = 128/gcd(C,128) rows per vector row -> packed width
    # lcm(C,128) is a multiple of 128 (lane-dense), works for any small C.
    g = 128 // math.gcd(C, 128)
    width = g * C
    use_packed = (g > 1) and (width <= _MAX_PACKED_WIDTH)

    x2 = x.reshape(M, C)
    if use_packed:
        m_pad = _round_up(M, g)
        if m_pad != M:
            # Pad a few rows (one small HBM copy) instead of falling back to the
            # 2-3x slower lane-sparse path; padded rows are row-local garbage and
            # are sliced off below.
            x2 = jnp.pad(x2, ((0, m_pad - M), (0, 0)))
        rows = m_pad // g
        x2 = x2.reshape(rows, width)                            # free contiguous view
        w2 = jnp.tile(weight.reshape(-1), (g,)).reshape(1, width)
        b2 = jnp.tile(bias.reshape(-1), (g,)).reshape(1, width)
        seg = jnp.arange(width, dtype=jnp.int32) // C
        avg = (seg[:, None] == seg[None, :]).astype(jnp.float32)  # (W, W) block-diag 0/1
        kernel = functools.partial(_ln_last_packed_kernel, eps=eps, inv_c=1.0 / C)
        # Live VMEM per block-row: 2x dbl-buffered in + 2x out (native dtype)
        # + ~4 full-width f32 temporaries (x cast, xc, matmul result, product).
        per_row = width * (2 * itemsize + 2 * itemsize + 4 * 4)
        tile = (_VMEM_BUDGET_BYTES - 2 * width * width * 4) // per_row
    else:
        width = C
        rows = M
        w2 = weight.reshape(1, width)
        b2 = bias.reshape(1, width)
        kernel = functools.partial(_ln_last_kernel, eps=eps)
        per_row = _round_up(width, 128) * (2 * itemsize + 2 * itemsize + 4 * 4)
        tile = _VMEM_BUDGET_BYTES // per_row

    tile = max(8, (tile // 8) * 8)
    # Feed both v7x TensorCores: keep >= _MIN_GRID_STEPS steps when enough work.
    if rows > _MIN_GRID_STEPS * 8:
        tile = min(tile, _round_up(pl.cdiv(rows, _MIN_GRID_STEPS), 8))
    tile = max(8, min(tile, _round_up(rows, 8)))
    grid = (pl.cdiv(rows, tile),)                               # edge block padded (rows independent)

    in_specs = [
        pl.BlockSpec((tile, width), lambda i: (i, 0)),
        pl.BlockSpec((1, width), lambda i: (0, 0)),
        pl.BlockSpec((1, width), lambda i: (0, 0)),
    ]
    operands = [x2, w2, b2]
    if use_packed:
        in_specs.append(pl.BlockSpec((width, width), lambda i: (0, 0)))
        operands.append(avg)

    out = pl.pallas_call(
        kernel,
        out_shape=jax.ShapeDtypeStruct((rows, width), x.dtype),
        grid=grid,
        in_specs=in_specs,
        out_specs=pl.BlockSpec((tile, width), lambda i: (i, 0)),
        compiler_params=pltpu.CompilerParams(
            dimension_semantics=("parallel",),
            vmem_limit_bytes=_VMEM_LIMIT_BYTES,
        ),
    )(*operands)

    if use_packed:
        out = out.reshape(-1, C)
        if out.shape[0] != M:
            out = out[:M]
    return out.reshape(orig_shape)


# ----------------------------- channels_first -----------------------------
def _ln_first_kernel(x_ref, w_ref, b_ref, o_ref, *, eps):
    """Block (C, TILE_HW): C on sublanes, spatial on lanes; reduce over C."""
    x = x_ref[...].astype(jnp.float32)                          # (C, TILE_HW)
    mean = jnp.mean(x, axis=0, keepdims=True)                   # (1, TILE_HW)
    xc = x - mean
    var = jnp.mean(xc * xc, axis=0, keepdims=True)              # biased variance
    scale = w_ref[...].astype(jnp.float32) * jax.lax.rsqrt(var + eps)   # (C,1)*(1,HW)
    o_ref[...] = (xc * scale + b_ref[...].astype(jnp.float32)).astype(o_ref.dtype)


def layer_norm_channels_first(x, weight, bias, eps=1e-6):
    N, C, H, W = x.shape
    HW = H * W
    itemsize = jnp.dtype(x.dtype).itemsize
    x3 = x.reshape(N, C, HW)
    w2 = weight.reshape(C, 1)
    b2 = bias.reshape(C, 1)

    # Live VMEM per lane column: 2x dbl-buffered in + 2x out (native dtype) plus
    # ~3 full-block f32 temporaries; spatial tile is a multiple of 128 sized to
    # ~4 MiB so it fits v7x's 64 MiB VMEM with the f32 inflation accounted for.
    per_col = _round_up(C, 8) * (2 * itemsize + 2 * itemsize + 3 * 4)
    tile_hw_cap = max(128, (_VMEM_BUDGET_BYTES // per_col) // 128 * 128)
    tile_hw = HW if HW <= tile_hw_cap else tile_hw_cap
    # Give both v7x TensorCores work when the batch axis alone cannot.
    if N * pl.cdiv(HW, tile_hw) < 2 and HW >= 256:
        tile_hw = _round_up(pl.cdiv(HW, 2), 128)
    grid = (N, pl.cdiv(HW, tile_hw))

    out = pl.pallas_call(
        functools.partial(_ln_first_kernel, eps=eps),
        out_shape=jax.ShapeDtypeStruct((N, C, HW), x.dtype),
        grid=grid,
        in_specs=[
            pl.BlockSpec((pl.Squeezed(), C, tile_hw), lambda n, h: (n, 0, h)),
            pl.BlockSpec((C, 1), lambda n, h: (0, 0)),
            pl.BlockSpec((C, 1), lambda n, h: (0, 0)),
        ],
        out_specs=pl.BlockSpec((pl.Squeezed(), C, tile_hw), lambda n, h: (n, 0, h)),
        compiler_params=pltpu.CompilerParams(
            dimension_semantics=("parallel", "parallel"),
            vmem_limit_bytes=_VMEM_LIMIT_BYTES,
        ),
    )(x3, w2, b2)
    return out.reshape(N, C, H, W)


# ----------------------------- references -----------------------------
def _ref_last(x, w, b, eps):
    xf = x.astype(jnp.float32)
    mean = jnp.mean(xf, axis=-1, keepdims=True)
    var = jnp.mean((xf - mean) ** 2, axis=-1, keepdims=True)
    return ((xf - mean) / jnp.sqrt(var + eps) * w + b).astype(x.dtype)


def _ref_first(x, w, b, eps):
    xf = x.astype(jnp.float32)
    u = jnp.mean(xf, axis=1, keepdims=True)
    s = jnp.mean((xf - u) ** 2, axis=1, keepdims=True)
    y = (xf - u) / jnp.sqrt(s + eps)
    return (w[None, :, None, None] * y + b[None, :, None, None]).astype(x.dtype)


if __name__ == "__main__":
    key = jax.random.PRNGKey(0)
    ks = jax.random.split(key, 12)
    eps = 1e-6

    # channels_first: NCHW, normalized_shape = C = 4
    x_cf = jax.random.normal(ks[0], (2, 4, 16, 16), dtype=jnp.float32)
    w_cf = jnp.ones((4,), jnp.float32) + 0.1 * jax.random.normal(ks[1], (4,), jnp.float32)
    b_cf = 0.1 * jax.random.normal(ks[2], (4,), jnp.float32)
    out_cf = jax.block_until_ready(layer_norm_channels_first(x_cf, w_cf, b_cf, eps))
    assert jnp.allclose(out_cf, _ref_first(x_cf, w_cf, b_cf, eps), atol=1e-5, rtol=1e-5), \
        "channels_first mismatch"

    # channels_last: NHWC, C = 32 -> packed width 128 (MXU segment-sum path)
    x_cl = jax.random.normal(ks[3], (2, 16, 16, 32), dtype=jnp.float32)
    w_cl = jnp.ones((32,), jnp.float32) + 0.1 * jax.random.normal(ks[4], (32,), jnp.float32)
    b_cl = 0.1 * jax.random.normal(ks[5], (32,), jnp.float32)
    out_cl = jax.block_until_ready(layer_norm_channels_last(x_cl, w_cl, b_cl, eps))
    assert jnp.allclose(out_cl, _ref_last(x_cl, w_cl, b_cl, eps), atol=1e-5, rtol=1e-5), \
        "channels_last (packed, C=32) mismatch"

    # channels_last non-power-of-two small C: C = 48 -> packed width 384
    x_np2 = jax.random.normal(ks[6], (2, 8, 8, 48), dtype=jnp.float32)
    w_np2 = jnp.ones((48,), jnp.float32) + 0.1 * jax.random.normal(ks[7], (48,), jnp.float32)
    b_np2 = 0.1 * jax.random.normal(ks[8], (48,), jnp.float32)
    out_np2 = jax.block_until_ready(layer_norm_channels_last(x_np2, w_np2, b_np2, eps))
    assert jnp.allclose(out_np2, _ref_last(x_np2, w_np2, b_np2, eps), atol=1e-5, rtol=1e-5), \
        "channels_last (packed, C=48) mismatch"

    # channels_last with M % g != 0 (row padding path): (3, 5, 32) -> M=15, g=4
    x_pad = jax.random.normal(ks[9], (3, 5, 32), dtype=jnp.float32)
    out_pad = jax.block_until_ready(layer_norm_channels_last(x_pad, w_cl, b_cl, eps))
    assert jnp.allclose(out_pad, _ref_last(x_pad, w_cl, b_cl, eps), atol=1e-5, rtol=1e-5), \
        "channels_last (padded rows) mismatch"

    # channels_last fallback path: C = 160 (lcm(160,128)=640 > cap -> plain kernel)
    x_fb = jax.random.normal(ks[10], (2, 4, 4, 160), dtype=jnp.float32)
    w_fb = jnp.ones((160,), jnp.float32) + 0.1 * jax.random.normal(ks[11], (160,), jnp.float32)
    b_fb = 0.1 * jax.random.normal(ks[1], (160,), jnp.float32)
    out_fb = jax.block_until_ready(layer_norm_channels_last(x_fb, w_fb, b_fb, eps))
    assert jnp.allclose(out_fb, _ref_last(x_fb, w_fb, b_fb, eps), atol=1e-5, rtol=1e-5), \
        "channels_last (fallback) mismatch"

    print("KERNEL_OK")
</pallas_src>

<mosaic_0001>
module attributes {stable_mosaic.version = 11 : i64} {
  func.func @_ln_first_kernel(%arg0: i32, %arg1: i32, %arg2: memref<1x4x256xf32, #tpu.memory_space<vmem>>, %arg3: memref<4x1xf32, #tpu.memory_space<vmem>>, %arg4: memref<4x1xf32, #tpu.memory_space<vmem>>, %arg5: memref<1x4x256xf32, #tpu.memory_space<vmem>>) attributes {dimension_semantics = [#tpu.dimension_semantics<parallel>, #tpu.dimension_semantics<parallel>], iteration_bounds = array<i64: 2, 1>, scalar_prefetch = 0 : i64, scratch_operands = 0 : i64, tpu.core_type = #tpu.core_type<tc>, window_params = [{transform_indices = @transform_0, window_bounds = array<i64: 1, 4, 256>}, {pipeline_mode = #tpu.pipeline_mode<synchronous>, transform_indices = @transform_1, window_bounds = array<i64: 4, 1>}, {pipeline_mode = #tpu.pipeline_mode<synchronous>, transform_indices = @transform_2, window_bounds = array<i64: 4, 1>}, {transform_indices = @transform_3, window_bounds = array<i64: 1, 4, 256>}]} {
    %c0 = arith.constant 0 : index
    %c0_0 = arith.constant 0 : index
    %c0_1 = arith.constant 0 : index
    %0 = vector.load %arg2[%c0, %c0_0, %c0_1] : memref<1x4x256xf32, #tpu.memory_space<vmem>>, vector<1x4x256xf32>
    %1 = vector.shape_cast %0 : vector<1x4x256xf32> to vector<4x256xf32>
    %cst = arith.constant dense<0.000000e+00> : vector<256xf32>
    %2 = vector.multi_reduction <add>, %1, %cst [0] : vector<4x256xf32> to vector<256xf32>
    %3 = vector.shape_cast %2 : vector<256xf32> to vector<1x256xf32>
    %cst_2 = arith.constant 4.000000e+00 : f32
    %4 = vector.broadcast %cst_2 : f32 to vector<1x256xf32>
    %5 = arith.divf %3, %4 : vector<1x256xf32>
    %6 = vector.broadcast %5 : vector<1x256xf32> to vector<4x256xf32>
    %7 = arith.subf %1, %6 : vector<4x256xf32>
    %8 = arith.mulf %7, %7 : vector<4x256xf32>
    %cst_3 = arith.constant dense<0.000000e+00> : vector<256xf32>
    %9 = vector.multi_reduction <add>, %8, %cst_3 [0] : vector<4x256xf32> to vector<256xf32>
    %10 = vector.shape_cast %9 : vector<256xf32> to vector<1x256xf32>
    %cst_4 = arith.constant 4.000000e+00 : f32
    %11 = vector.broadcast %cst_4 : f32 to vector<1x256xf32>
    %12 = arith.divf %10, %11 : vector<1x256xf32>
    %c0_5 = arith.constant 0 : index
    %c0_6 = arith.constant 0 : index
    %13 = vector.load %arg3[%c0_5, %c0_6] : memref<4x1xf32, #tpu.memory_space<vmem>>, vector<4x1xf32>
    %cst_7 = arith.constant 9.99999997E-7 : f32
    %14 = vector.broadcast %cst_7 : f32 to vector<1x256xf32>
    %15 = arith.addf %12, %14 : vector<1x256xf32>
    %16 = math.rsqrt %15 : vector<1x256xf32>
    %17 = vector.broadcast %13 : vector<4x1xf32> to vector<4x256xf32>
    %18 = vector.broadcast %16 : vector<1x256xf32> to vector<4x256xf32>
    %19 = arith.mulf %17, %18 : vector<4x256xf32>
    %20 = arith.mulf %7, %19 : vector<4x256xf32>
    %c0_8 = arith.constant 0 : index
    %c0_9 = arith.constant 0 : index
    %21 = vector.load %arg4[%c0_8, %c0_9] : memref<4x1xf32, #tpu.memory_space<vmem>>, vector<4x1xf32>
    %22 = vector.broadcast %21 : vector<4x1xf32> to vector<4x256xf32>
    %23 = arith.addf %20, %22 : vector<4x256xf32>
    %c0_10 = arith.constant 0 : index
    %c0_11 = arith.constant 0 : index
    %c0_12 = arith.constant 0 : index
    %24 = vector.load %arg5[%c0_10, %c0_11, %c0_12] : memref<1x4x256xf32, #tpu.memory_space<vmem>>, vector<1x4x256xf32>
    %25 = vector.shape_cast %24 : vector<1x4x256xf32> to vector<4x256xf32>
    %26 = vector.shape_cast %23 : vector<4x256xf32> to vector<1x4x256xf32>
    tpu.vector_store %arg5[%c0_10, %c0_11, %c0_12], %26 {strides = array<i32>} : memref<1x4x256xf32, #tpu.memory_space<vmem>>, vector<1x4x256xf32>,
    return
  }
  func.func @transform_0(%arg0: i32, %arg1: i32) -> (i32, i32, i32) {
    %c0_i32 = arith.constant 0 : i32
    %c0_i32_0 = arith.constant 0 : i32
    return %arg0, %c0_i32, %arg1 : i32, i32, i32
  }
  func.func @transform_1(%arg0: i32, %arg1: i32) -> (i32, i32) {
    %c0_i32 = arith.constant 0 : i32
    %c0_i32_0 = arith.constant 0 : i32
    %c0_i32_1 = arith.constant 0 : i32
    return %c0_i32, %c0_i32_0 : i32, i32
  }
  func.func @transform_2(%arg0: i32, %arg1: i32) -> (i32, i32) {
    %c0_i32 = arith.constant 0 : i32
    %c0_i32_0 = arith.constant 0 : i32
    %c0_i32_1 = arith.constant 0 : i32
    return %c0_i32, %c0_i32_0 : i32, i32
  }
  func.func @transform_3(%arg0: i32, %arg1: i32) -> (i32, i32, i32) {
    %c0_i32 = arith.constant 0 : i32
    %c0_i32_0 = arith.constant 0 : i32
    return %arg0, %c0_i32, %arg1 : i32, i32, i32
  }
}

</mosaic_0001>

<bundles_post_ra>
// kernel: tpu_custom_call.1
= control target key start
LH: loop header
LB: loop body
LE: loop exit
PB: predicated region body
PF: predicated region fallthrough
CT: control target
= control target key end

     0   :  { %8 = vsyncpa [#allocation3], 0  ;;  %s782_s0 = inlined_call_operand.hbm [shape: f32[2,4,256], index: 0, kind: input, shape index: {}]   ;;  %s783_s1 = inlined_call_operand.vmem [shape: f32[4,1], index: 1, kind: input, shape index: {}]   ;;  %s784_s2 = inlined_call_operand.vmem [shape: f32[4,1], index: 2, kind: input, shape index: {}]   ;;  %s785_s3 = inlined_call_operand.hbm [shape: f32[2,4,256], index: 3, kind: output, shape index: {}]  }
   0x1   :  { %10 = vsyncpa [#allocation3 + $0x1], 0 }
   0x2   :  { %11 = vsyncpa [#allocation4], 0 }
   0x3   :  { %13 = vsyncpa [#allocation4 + $0x1], 0  ;;  %s646_s12 = smov 0   ;;  %s648_s13 = smov 0  }
   0x4   :  { %s650_s14 = smov 0   ;;  %s652_s15 = smov 0  }
   0x5   :  { %s654_s16 = smov 0   ;;  %s656_s17 = smov 0  }
   0x6 LB: > { %s420_s18 = sadd.s32 4294967295, %s621_s17   ;;  %s421_s19 = sadd.s32 4294967294, %s621_s17   ;;  %s621_s17 = sphi %s656_s17, %s19_s17   ;;  %s617_s16 = sphi %s654_s16, %s794_s16   ;;  %s613_s15 = sphi %s652_s15, %s793_s15   ;;  %s609_s14 = sphi %s650_s14, %s792_s14   ;;  %s605_s13 = sphi %s648_s13, %s791_s13   ;;  %s601_s12 = sphi %s646_s12, %s790_s12  }
   0x7   : > { %s31_s20 = sadd.s32 1, %s617_s16  ;;  %s40_s21 = sadd.s32 1, %s609_s14 }
   0x8   : > { %p33_p0 = scmp.ge.s32.totalorder %s31_s20, 2  ;;  %p47_p1 = scmp.ne.s32.totalorder %s609_s14, %s605_s13 }
   0x9   : > { %p48_p2 = scmp.eq.s32.totalorder %s621_s17, 0  ;;  %p53_p3 = scmp.ne.s32.totalorder %s605_s13, %s601_s12 }
   0xa   : > { %s796_s20 = smov (%p33_p0, %s31_s20), 0  ;;  %p54_p5 = scmp.eq.s32.totalorder %s420_s18, 0 }
   0xb   : > { %p687_p4 = por %p48_p2, %p47_p1  ;;  %s35_s23 = ssub.s32 %s617_s16, %s796_s20 }
   0xc   : > { %p121_p6 = scmp.eq.s32.totalorder %s420_s18, 1  ;;  %p38_p7 = scmp.eq.s32.totalorder %s35_s23, 0 }
   0xd   : > { %p693_p8 = por %p54_p5, %p53_p3  ;;  %p127_p10 = scmp.eq.s32.totalorder %s421_s19, 1 }
   0xe   : > { %p697_p9 = por %p121_p6, %p47_p1  ;;  %p423_p12 = scmp.ge.s32.totalorder %s621_s17, 2 }
   0xf   : > { %s702_s26 = scalar_select %p38_p7, %s609_s14, %s40_s21  }
  0x10   : > { %p704_p11 = por %p127_p10, %p53_p3  ;;  %p449_p13 = scmp.lt.s32.totalorder %s621_s17, 2 }
  0x11   : > { %s153_s28 = sand.u32 1, %s609_s14   ;;  %s435_s30 = sshll.u32 %s617_s16, 3 }
  0x12   : > { %s424_s29 = sshll.u32 %s153_s28, 3  ;;  %s164_s6 = scalar_lea.hbm %s782_s0, %s435_s30 }
  0x13   : > { %s157_s7 = scalar_lea.vmem [#allocation2], %s424_s29  ;;  %s166_s9 = sshll.u32 %s164_s6, 4  ;;  %s167_s9 = int_to_ptr.hbm [resolvable:$true] %s166_s9 }
  0x14   : > { %s168_s8 = sshll.u32 %s157_s7, 4  ;;  %p442_p0 = pnand %p449_p13, %p687_p4  ;;  %s169_s8 = int_to_ptr.vmem [resolvable:$true] %s168_s8 }
  0x15   : > { %p427_p1 = scmp.ge.s32.totalorder %s621_s17, 1  ;;  %p173_p2 = scmp.lt.s32.totalorder %s621_s17, 3 }
  0x16   : > { %s154_s10 = scalar_lea.sflag [#allocation3], %s153_s28 }
  0x17   : > { %444 = dma.hbm_to_vmem [thread:$0]  (!%p442_p0), %s167_s9, 128, %s169_s8, %s154_s10  }
  0x18   : > { %p174_p3 = pnand %p427_p1, %p173_p2 }
  0x19   : > { %s720_s11 = sand.u32 (!%p174_p3), 1, %s605_s13  }
  0x1a   : > { %177 = sbr.rel (%p174_p3) target bundleno = 164 (0xa4), region = 32  ;;  %s428_s18 = sshll.u32 (!%p174_p3), %s720_s11, 3 }
  0x1b   : > { %s180_s19 = scalar_lea.sflag (!%p174_p3), [#allocation3], %s720_s11  ;;  %s183_s21 = scalar_lea.vmem (!%p174_p3), [#allocation2], %s428_s18 }
  0x1f   : > { %592 = dma.done.wait (%p693_p8), %s180_s19, 128  }
  0x20   : > { %594 = vsyncadd (%p693_p8), %s180_s19, 4294967168  ;;  %v623_v0 = vmov 0   ;;  %v269_v1 = vld [vmem:[%s783_s1] sm:$0xf]  ;;  %v624_v2 = vmov 4.0   ;;  %v209_v5 = vld [vmem:[%s183_s21] sm:$0xff] }
  0x21   : > { %502 = vset.pattern.permute.xlu0 %v623_v0  ;;  %503 = vrcp.f32 %v624_v2  ;;  %v305_v3 = vld [vmem:[%s784_s2] sm:$0xf]  ;;  %211 = vst [vmem:[#allocation1] ss:$2 sm:$0xff] %v209_v5  ;;  %vm216_vm0 = vcmask 1043456   ;;  %s436_s24 = sshll.u32 %s613_s15, 3 }
  0x22   : > { %294 = vperm.xlu0 %502, %v269_v1   ;;  %s331_s5 = scalar_lea.hbm %s785_s3, %s436_s24  ;;  %s206_s6 = scalar_lea.vmem [#allocation5], %s428_s18 }
  0x23   : > { %s333_s7 = sshll.u32 %s206_s6, 4  ;;  %s335_s8 = sshll.u32 %s331_s5, 4  ;;  %s334_s7 = int_to_ptr.vmem [resolvable:$true] %s333_s7  ;;  %s336_s8 = int_to_ptr.hbm [resolvable:$true] %s335_s8 }
  0x24   : > { %s318_s15 = scalar_lea.sflag [#allocation4], %s720_s11  ;;  %s553_s9 = sshra.s32 %s336_s8, 4  ;;  %s554_s9 = int_to_ptr.hbm [resolvable:$true] %s553_s9 }
  0x25   : > { %s555_s10 = scalar_lea.hbm %s554_s9, 8  ;;  %s559_s18 = scalar_lea.hbm %s785_s3, 16 }
  0x26   : > { %p556_p4 = scmp.ne.s32.totalorder %s554_s9, %s555_s10  ;;  %p560_p7 = scmp.lt.s32.totalorder %s554_s9, %s785_s3 }
  0x27   : > { %v504_v4 = vpop.eup %503  ;;  %p561_p8 = scmp.lt.s32.totalorder %s559_s18, %s555_s10 }
  0x28   : > { %v232_v6 = vmul.f32 4.0, %v504_v4  ;;  %v213_v8 = vld.sshfl [vmem:[#allocation1 + $0x8] sm:$0xff pattern:$0x75316420]  ;;  %vm236_vm1 = vweird.f32 %v504_v4  ;;  %p557_p5 = pnand %p556_p4, %p697_p9 }
  0x29   : > { %v224_v9 = vsel %vm216_vm0, %v213_v8, 0.0  ;;  %v212_v10 = vld.sshfl [vmem:[#allocation1] sm:$0xff pattern:$0x75316420]  ;;  %p562_p10 = por %p561_p8, %p560_p7 }
  0x2a   : > { %308 = vperm.xlu0 %502, %v305_v3   ;;  %v233_v7 = vsub.f32 1.0, %v232_v6  ;;  %v225_v11 = vrot.slane %v224_v9, 4  ;;  %v217_v13 = vsel %vm216_vm0, %v212_v10, 0.0  ;;  %p558_p6 = pneg %p557_p5 }
  0x2b   : > { %v218_v14 = vrot.slane %v217_v13, 4 }
  0x2c   : > { %v234_v12 = vmul.f32 %v504_v4, %v233_v7  ;;  %v226_v15 = vadd.f32 %v225_v11, %v224_v9  ;;  %p563_p13 = pnand %p562_p10, %p558_p6 }
  0x2d   : > { %v219_v16 = vadd.f32 %v218_v14, %v217_v13 }
  0x2e   : > { %v227_v17 = vrot.slane %v226_v15, 2  ;;  %v235_v18 = vadd.f32 %v504_v4, %v234_v12 }
  0x2f   : > { %v220_v19 = vrot.slane %v219_v16, 2 }
  0x30   : > { %v228_v20 = vadd.f32 %v227_v17, %v226_v15  ;;  %v237_v23 = vsel %vm236_vm1, %v504_v4, %v235_v18 }
  0x31   : > { %v221_v21 = vadd.f32 %v220_v19, %v219_v16 }
  0x32   : > { %v229_v22 = vrot.slane %v228_v20, 1 }
  0x33   : > { %v222_v24 = vrot.slane %v221_v21, 1 }
  0x34   : > { %v230_v25 = vadd.f32 %v229_v22, %v228_v20 }
  0x35   : > { %v223_v26 = vadd.f32 %v222_v24, %v221_v21 }
  0x36   : > { %v239_v27 = vmul.f32 %v237_v23, %v230_v25 }
  0x37   : > { %v238_v28 = vmul.f32 %v237_v23, %v223_v26 }
  0x38   : > { %v242_v29 = vrot.slane %v239_v27, 4 }
  0x3a   : > { %v243_v30 = vsel %vm216_vm0, %v238_v28, %v242_v29 }
  0x3b   : > { %v245_v31 = vsub.f32 %v209_v5, %v243_v30  ;;  %v625_v5 = vmov 839922192  }
  0x3c   : > { %v311_v6 = vunpack.c.l.s4 %v625_v5 }
  0x3d   : > { %v246_v32 = vmul.f32 %v245_v31, %v245_v31 }
  0x3e   : > { %v312_v9 = vunpack.c.0.s8 %v311_v6 }
  0x3f   : > { %248 = vst [vmem:[#allocation1] ss:$2 sm:$0xff] %v246_v32 }
  0x46   : > { %v250_v33 = vld.sshfl [vmem:[#allocation1 + $0x8] sm:$0xff pattern:$0x75316420]  ;;  %v249_v34 = vld.sshfl [vmem:[#allocation1] sm:$0xff pattern:$0x75316420] }
  0x47   : > { %v260_v35 = vsel %vm216_vm0, %v250_v33, 0.0  ;;  %v253_v36 = vsel %vm216_vm0, %v249_v34, 0.0 }
  0x48   : > { %v261_v37 = vrot.slane %v260_v35, 4  ;;  %v254_v38 = vrot.slane %v253_v36, 4 }
  0x4a   : > { %v262_v39 = vadd.f32 %v261_v37, %v260_v35  ;;  %v255_v40 = vadd.f32 %v254_v38, %v253_v36 }
  0x4c   : > { %v263_v41 = vrot.slane %v262_v39, 2  ;;  %v256_v42 = vrot.slane %v255_v40, 2 }
  0x4e   : > { %v264_v43 = vadd.f32 %v263_v41, %v262_v39  ;;  %v257_v44 = vadd.f32 %v256_v42, %v255_v40 }
  0x50   : > { %v265_v45 = vrot.slane %v264_v43, 1  ;;  %v258_v46 = vrot.slane %v257_v44, 1 }
  0x52   : > { %v266_v47 = vadd.f32 %v265_v45, %v264_v43  ;;  %v259_v48 = vadd.f32 %v258_v46, %v257_v44 }
  0x54   : > { %v268_v49 = vmul.f32 %v266_v47, %v237_v23  ;;  %v267_v50 = vmul.f32 %v259_v48, %v237_v23 }
  0x56   : > { %v271_v51 = vadd.f32 1e-06, %v268_v49  ;;  %v270_v52 = vadd.f32 1e-06, %v267_v50 }
  0x58   : > { %505 = vrsqrt.f32 %v271_v51  ;;  %vm288_vm2 = vweird.f32 %v271_v51  ;;  %vm278_vm4 = vweird.f32 %v270_v52 }
  0x59   : > { %507 = vrsqrt.f32 %v270_v52 }
  0x5e   : > { %v506_v53 = vpop.eup %505 }
  0x5f   : > { %v508_v54 = vpop.eup %507  ;;  %v283_v55 = vmul.f32 %v506_v53, %v271_v51  ;;  %vm289_vm3 = vweird.f32 %v506_v53 }
  0x60   : > { %v273_v56 = vmul.f32 %v508_v54, %v270_v52  ;;  %vm279_vm5 = vweird.f32 %v508_v54  ;;  %vm290_vm6 = vmor %vm288_vm2, %vm289_vm3 }
  0x61   : > { %v284_v57 = vmul.f32 %v506_v53, %v283_v55  ;;  %vm280_vm7 = vmor %vm278_vm4, %vm279_vm5 }
  0x62   : > { %v274_v58 = vmul.f32 %v508_v54, %v273_v56 }
  0x63   : > { %v285_v59 = vmul.f32 0.5, %v284_v57 }
  0x64   : > { %v275_v60 = vmul.f32 0.5, %v274_v58 }
  0x65   : > { %v286_v61 = vsub.f32 1.5, %v285_v59 }
  0x66   : > { %v276_v62 = vsub.f32 1.5, %v275_v60 }
  0x67   : > { %v287_v63 = vmul.f32 %v506_v53, %v286_v61 }
  0x68   : > { %v277_v0 = vmul.f32 %v508_v54, %v276_v62 }
  0x69   : > { %v291_v1 = vsel %vm290_vm6, %v506_v53, %v287_v63 }
  0x6a   : > { %v281_v3 = vsel %vm280_vm7, %v508_v54, %v277_v0 }
  0x94   : > { %v295_v2 = vpop.permute.xlu0 %294 }
  0x95   : > { %v298_v4 = vmul.f32 %v295_v2, %v291_v1  ;;  %v297_v8 = vmul.f32 %v295_v2, %v281_v3 }
  0x97   : > { %v301_v7 = vrot.slane %v298_v4, 4 }
  0x99   : > { %v302_v10 = vsel %vm216_vm0, %v297_v8, %v301_v7 }
  0x9a   : > { %v304_v12 = vmul.f32 %v302_v10, %v245_v31 }
  0x9c   : > { %v309_v11 = vpop.permute.xlu0 %308 }
  0x9d   : > { %v313_v13 = vperm.slane %v309_v11, %v312_v9 }
  0x9f   : > { %v315_v14 = vadd.f32 %v313_v13, %v304_v12 }
  0xa1   : > { %316 = vst [vmem:[%s206_s6] sm:$0xff] %v315_v14 }
  0xa2   : > { %566 = shalt.err (!%p563_p13)
}
  0xa3   : > { %439 = dma.vmem_to_hbm [thread:$0]  (%p697_p9), %s334_s7, 128, %s336_s8, %s318_s15  }
  0xa4 PF: > { %s347_s11 = sand.u32 1, %s601_s12   ;;  %p446_p0 = pnand %p423_p12, %p704_p11 }
  0xa5   : > { %s348_s28 = scalar_lea.sflag [#allocation4], %s347_s11 }
  0xa6   : > { %p447_p1 = pneg %p446_p0 }
  0xa8   : > { %596 = dma.done.wait (%p447_p1), %s348_s28, 128  }
  0xa9   : > { %598 = vsyncadd (%p447_p1), %s348_s28, 4294967168  ;;  %s19_s17 = sadd.s32 1, %s621_s17   ;;  %s790_s12 = smov %s605_s13 }
  0xaa   : > { %p16_p2 = scmp.ge.s32.totalorder %s19_s17, 4   ;;  %s791_s13 = smov %s609_s14 }
  0xab   : > { %s792_s14 = smov %s702_s26  ;;  %s793_s15 = smov %s617_s16 }
  0xac   : > { %s794_s16 = smov %s796_s20  ;;  %18 = sbr.rel (!%p16_p2) target bundleno = 6 (0x6), region = 77 }
  0xb1   :  { %354 = vsyncpa [#allocation3], 1 }
  0xb2   :  { %356 = vsyncpa [#allocation3 + $0x1], 1 }
  0xb3   :  { %357 = vsyncpa [#allocation4], 1 }
  0xb4   :  { %359 = vsyncpa [#allocation4 + $0x1], 1 }

</bundles_post_ra>
